<compile_context>
chip_gen: v7x
topology: tpu7x:2x2x1
jax: 0.10.0
libtpu: 0.0.40
codegen_flags: <defaults>
</compile_context>

<pallas_src>
import functools

import jax
import jax.numpy as jnp
from jax.experimental import pallas as pl
from jax.experimental.pallas import tpu as pltpu

_HIGHEST = jax.lax.Precision.HIGHEST
_EPS = 1e-5


def _mm(a, b, mxu_dtype):
    """(M, K) @ (K, N) on the MXU with f32 accumulation."""
    if jnp.dtype(mxu_dtype) == jnp.dtype(jnp.float32):
        return jnp.dot(a, b, preferred_element_type=jnp.float32,
                       precision=_HIGHEST)
    return jnp.dot(a.astype(mxu_dtype), b.astype(mxu_dtype),
                   preferred_element_type=jnp.float32)


# ---------------------------------------------------------------------------
# Stage 1: fused Conv1d(k=3, p=1) + Conv1d(k=1)  ->  h1 (NLC), partial BN1 stats
# ---------------------------------------------------------------------------
def _stage1_kernel(x_ref, w_ref, b_ref, h_ref, st_ref, *, mxu_dtype):
    x = x_ref[0]                                   # (C_in, L)  NCL tile
    xt = x.T                                       # (L, C_in)  channels-last
    l, c_in = xt.shape
    zero = jnp.zeros((1, c_in), jnp.float32)
    xp = jnp.concatenate([zero, xt, zero], axis=0)                # (L+2, C_in)
    stacked = jnp.concatenate([xp[0:l], xp[1:l + 1], xp[2:l + 2]],
                              axis=1)                             # (L, 3*C_in)
    h = _mm(stacked, w_ref[...], mxu_dtype) + b_ref[...]          # (L, C_mid)
    h_ref[0] = h
    s = jnp.sum(h, axis=0, keepdims=True)
    s2 = jnp.sum(h * h, axis=0, keepdims=True)
    st_ref[0] = jnp.concatenate([s, s2], axis=0)                  # (2, C_mid)


# ---------------------------------------------------------------------------
# Stage 2: BN1 + Swish + Conv1d(k=3, s=2, p=1)  ->  h2 (NLC), partial BN2 stats
# ---------------------------------------------------------------------------
def _stage2_kernel(h1_ref, sc_ref, sh_ref, w_ref, b_ref, h2_ref, st_ref,
                   pad_ref, *, mxu_dtype):
    l = h1_ref.shape[1]
    l_out = h2_ref.shape[1]
    y = h1_ref[0] * sc_ref[...] + sh_ref[...]      # folded BatchNorm1d (f32)
    y = y * jax.nn.sigmoid(y)                      # Swish (f32, EUP)
    # zero-padded copy in VMEM scratch: row r holds position r-1 (conv pad = 1)
    pad_ref[...] = jnp.zeros(pad_ref.shape, pad_ref.dtype)
    pad_ref[pl.ds(1, l), :] = y
    # stride-2 taps: output o reads padded rows 2o, 2o+1, 2o+2
    x0 = pad_ref[pl.ds(0, l_out, 2), :]
    x1 = pad_ref[pl.ds(1, l_out, 2), :]
    x2 = pad_ref[pl.ds(2, l_out, 2), :]
    stacked = jnp.concatenate([x0, x1, x2], axis=1)               # (Lo, 3*C_mid)
    h2 = _mm(stacked, w_ref[...], mxu_dtype) + b_ref[...]         # (Lo, C_out)
    h2_ref[0] = h2
    s = jnp.sum(h2, axis=0, keepdims=True)
    s2 = jnp.sum(h2 * h2, axis=0, keepdims=True)
    st_ref[0] = jnp.concatenate([s, s2], axis=0)                  # (2, C_out)


# ---------------------------------------------------------------------------
# Stage 3: BN2 + Swish, written back in NCL layout
# ---------------------------------------------------------------------------
def _stage3_kernel(h2_ref, sc_ref, sh_ref, o_ref):
    y = h2_ref[0] * sc_ref[...] + sh_ref[...]
    y = y * jax.nn.sigmoid(y)
    o_ref[0] = y.T.astype(o_ref.dtype)             # (C_out, L_out)  NCL


def _finalize_bn(stats, gamma, beta, count):
    """Global (training-mode, biased) BN stats -> folded per-channel scale/shift."""
    s = jnp.sum(stats[:, 0, :], axis=0)
    s2 = jnp.sum(stats[:, 1, :], axis=0)
    mean = s / count
    var = jnp.maximum(s2 / count - mean * mean, 0.0)
    inv = jax.lax.rsqrt(var + _EPS)                # one rsqrt per channel
    scale = gamma * inv
    shift = beta - mean * scale
    return scale[None, :].astype(jnp.float32), shift[None, :].astype(jnp.float32)


@functools.partial(jax.jit, static_argnames=("mxu_dtype",))
def convblock_forward(x_ncl, params, mxu_dtype=jnp.bfloat16):
    """ConvBlock forward.  x_ncl: (N, C_in, L) f32 (PyTorch NCL layout)."""
    n, c_in, l = x_ncl.shape
    w1, b1 = params["w1"], params["b1"]            # (C_out, C_in, 3), (C_out,)
    w2, b2 = params["w2"], params["b2"]            # (C_mid, C_out, 1), (C_mid,)
    w3, b3 = params["w3"], params["b3"]            # (C_out, C_mid, 3), (C_out,)
    g1, be1 = params["g1"], params["be1"]
    g2, be2 = params["g2"], params["be2"]
    c_out, c_mid = w1.shape[0], w2.shape[0]
    l_out = (l - 1) // 2 + 1                       # k=3, stride=2, pad=1
    lp = 2 * l_out + 2                             # padded length for stride-2 conv

    # --- fold Conv(k3) . Conv(k1) into one k3 conv (tiny, done in the wrapper) ---
    w2m = w2[:, :, 0]                                              # (C_mid, C_out)
    w12 = jnp.concatenate(
        [jnp.matmul(w1[:, :, k].T, w2m.T, precision=_HIGHEST) for k in range(3)],
        axis=0)                                                    # (3*C_in, C_mid)
    b12 = (jnp.matmul(b1[None, :], w2m.T, precision=_HIGHEST)[0] + b2)[None, :]
    w3f = jnp.concatenate([w3[:, :, k].T for k in range(3)], axis=0)  # (3*C_mid, C_out)
    b3r = b3[None, :]
    # only the matmul operands are narrowed; biases / BN / Swish stay f32
    w12 = w12.astype(mxu_dtype)
    w3f = w3f.astype(mxu_dtype)
    x_ncl = x_ncl.astype(jnp.float32)

    cparams = pltpu.CompilerParams(
        dimension_semantics=("parallel",),         # batch tiles -> 2 TCs on v7x
        vmem_limit_bytes=32 * 1024 * 1024)

    def bcast2(shape):
        return pl.BlockSpec(shape, lambda i: (0, 0))

    # ---- stage 1: fused conv12, per-sample tiles, partial BN1 stats ----------
    h1, st1 = pl.pallas_call(
        functools.partial(_stage1_kernel, mxu_dtype=mxu_dtype),
        grid=(n,),
        in_specs=[pl.BlockSpec((1, c_in, l), lambda i: (i, 0, 0)),
                  bcast2((3 * c_in, c_mid)),
                  bcast2((1, c_mid))],
        out_specs=(pl.BlockSpec((1, l, c_mid), lambda i: (i, 0, 0)),
                   pl.BlockSpec((1, 2, c_mid), lambda i: (i, 0, 0))),
        out_shape=(jax.ShapeDtypeStruct((n, l, c_mid), jnp.float32),
                   jax.ShapeDtypeStruct((n, 2, c_mid), jnp.float32)),
        compiler_params=cparams,
        cost_estimate=pl.CostEstimate(
            flops=2 * n * l * 3 * c_in * c_mid,
            transcendentals=0,
            bytes_accessed=4 * n * (c_in * l + l * c_mid + 2 * c_mid)),
    )(x_ncl, w12, b12)

    scale1, shift1 = _finalize_bn(st1, g1, be1, n * l)

    # ---- stage 2: BN1 + Swish + conv3 (k3, stride 2), partial BN2 stats ------
    h2, st2 = pl.pallas_call(
        functools.partial(_stage2_kernel, mxu_dtype=mxu_dtype),
        grid=(n,),
        in_specs=[pl.BlockSpec((1, l, c_mid), lambda i: (i, 0, 0)),
                  bcast2((1, c_mid)), bcast2((1, c_mid)),
                  bcast2((3 * c_mid, c_out)), bcast2((1, c_out))],
        out_specs=(pl.BlockSpec((1, l_out, c_out), lambda i: (i, 0, 0)),
                   pl.BlockSpec((1, 2, c_out), lambda i: (i, 0, 0))),
        out_shape=(jax.ShapeDtypeStruct((n, l_out, c_out), jnp.float32),
                   jax.ShapeDtypeStruct((n, 2, c_out), jnp.float32)),
        scratch_shapes=[pltpu.VMEM((lp, c_mid), jnp.float32)],
        compiler_params=cparams,
        cost_estimate=pl.CostEstimate(
            flops=2 * n * l_out * 3 * c_mid * c_out,
            transcendentals=n * l * c_mid,
            bytes_accessed=4 * n * (l * c_mid + l_out * c_out + 2 * c_out)),
    )(h1, scale1, shift1, w3f, b3r)

    scale2, shift2 = _finalize_bn(st2, g2, be2, n * l_out)

    # ---- stage 3: BN2 + Swish, NCL output -------------------------------------
    out = pl.pallas_call(
        _stage3_kernel,
        grid=(n,),
        in_specs=[pl.BlockSpec((1, l_out, c_out), lambda i: (i, 0, 0)),
                  bcast2((1, c_out)), bcast2((1, c_out))],
        out_specs=pl.BlockSpec((1, c_out, l_out), lambda i: (i, 0, 0)),
        out_shape=jax.ShapeDtypeStruct((n, c_out, l_out), jnp.float32),
        compiler_params=cparams,
        cost_estimate=pl.CostEstimate(
            flops=4 * n * l_out * c_out,
            transcendentals=n * l_out * c_out,
            bytes_accessed=4 * n * 2 * l_out * c_out),
    )(h2, scale2, shift2)
    return out


# ---------------------------------------------------------------------------
# Pure-JAX reference with PyTorch semantics (NCL, training-mode BatchNorm)
# ---------------------------------------------------------------------------
def ref_forward(x_ncl, p):
    def conv(x, w, b, stride, pad):
        y = jax.lax.conv_general_dilated(
            x, w, window_strides=(stride,), padding=[(pad, pad)],
            dimension_numbers=('NCH', 'OIH', 'NCH'), precision=_HIGHEST)
        return y + b[None, :, None]

    def bn_swish(x, g, be):
        mu = x.mean(axis=(0, 2), keepdims=True)
        var = jnp.square(x - mu).mean(axis=(0, 2), keepdims=True)
        xn = (x - mu) / jnp.sqrt(var + _EPS) * g[None, :, None] + be[None, :, None]
        return xn * jax.nn.sigmoid(xn)

    h = conv(x_ncl, p['w1'], p['b1'], 1, 1)
    h = conv(h, p['w2'], p['b2'], 1, 0)
    h = bn_swish(h, p['g1'], p['be1'])
    h = conv(h, p['w3'], p['b3'], 2, 1)
    h = bn_swish(h, p['g2'], p['be2'])
    return h


def init_params(key, c_in, c_out):
    """Deterministic PyTorch-style init, torch weight layout."""
    ks = jax.random.split(key, 6)

    def conv_init(kw, kb, o, i, k):
        bound = 1.0 / (i * k) ** 0.5
        w = jax.random.uniform(kw, (o, i, k), jnp.float32, -bound, bound)
        b = jax.random.uniform(kb, (o,), jnp.float32, -bound, bound)
        return w, b

    c_mid = c_out // 2
    w1, b1 = conv_init(ks[0], ks[1], c_out, c_in, 3)
    w2, b2 = conv_init(ks[2], ks[3], c_mid, c_out, 1)
    w3, b3 = conv_init(ks[4], ks[5], c_out, c_mid, 3)
    return dict(w1=w1, b1=b1, w2=w2, b2=b2, w3=w3, b3=b3,
                g1=jnp.ones((c_mid,), jnp.float32),
                be1=jnp.zeros((c_mid,), jnp.float32),
                g2=jnp.ones((c_out,), jnp.float32),
                be2=jnp.zeros((c_out,), jnp.float32))


if __name__ == "__main__":
    key = jax.random.PRNGKey(0)
    kx, kp = jax.random.split(key)
    N, C_IN, C_OUT, L = 2, 4, 8, 16
    x = jax.random.normal(kx, (N, C_IN, L), jnp.float32)
    params = init_params(kp, C_IN, C_OUT)

    ref = jax.block_until_ready(ref_forward(x, params))
    l_out = (L - 1) // 2 + 1

    # exact-semantics path (f32 MXU operands, HIGHEST precision)
    out_f32 = jax.block_until_ready(
        convblock_forward(x, params, mxu_dtype=jnp.float32))
    assert out_f32.shape == (N, C_OUT, l_out), out_f32.shape
    assert jnp.allclose(out_f32, ref, atol=2e-4, rtol=2e-4), \
        float(jnp.max(jnp.abs(out_f32 - ref)))

    # default fast path (bf16 MXU operands, f32 accumulation / BN / Swish);
    # bf16 inputs give O(1e-2) abs error after two BatchNorms, hence the tolerance.
    out_bf16 = jax.block_until_ready(convblock_forward(x, params))
    assert out_bf16.shape == (N, C_OUT, l_out), out_bf16.shape
    assert jnp.allclose(out_bf16, ref, atol=5e-2, rtol=5e-2), \
        float(jnp.max(jnp.abs(out_bf16 - ref)))

    print("KERNEL_OK")
</pallas_src>

<mosaic_0001>
module attributes {stable_mosaic.version = 11 : i64} {
  func.func @_stage1_kernel(%arg0: i32, %arg1: memref<1x4x16xf32, #tpu.memory_space<vmem>>, %arg2: memref<12x4xf32, #tpu.memory_space<vmem>>, %arg3: memref<1x4xf32, #tpu.memory_space<vmem>>, %arg4: memref<1x16x4xf32, #tpu.memory_space<vmem>>, %arg5: memref<1x2x4xf32, #tpu.memory_space<vmem>>) attributes {dimension_semantics = [#tpu.dimension_semantics<parallel>], iteration_bounds = array<i64: 2>, scalar_prefetch = 0 : i64, scratch_operands = 0 : i64, tpu.core_type = #tpu.core_type<tc>, window_params = [{transform_indices = @transform_0, window_bounds = array<i64: 1, 4, 16>}, {pipeline_mode = #tpu.pipeline_mode<synchronous>, transform_indices = @transform_1, window_bounds = array<i64: 12, 4>}, {pipeline_mode = #tpu.pipeline_mode<synchronous>, transform_indices = @transform_2, window_bounds = array<i64: 1, 4>}, {transform_indices = @transform_3, window_bounds = array<i64: 1, 16, 4>}, {transform_indices = @transform_4, window_bounds = array<i64: 1, 2, 4>}]} {
    %c0 = arith.constant 0 : index
    %c0_0 = arith.constant 0 : index
    %c0_1 = arith.constant 0 : index
    %0 = vector.load %arg1[%c0, %c0_0, %c0_1] : memref<1x4x16xf32, #tpu.memory_space<vmem>>, vector<1x4x16xf32>
    %1 = vector.shape_cast %0 : vector<1x4x16xf32> to vector<4x16xf32>
    %2 = tpu.transpose %1, [1, 0] : vector<4x16xf32> -> vector<16x4xf32>
    %cst = arith.constant 0.000000e+00 : f32
    %3 = vector.broadcast %cst : f32 to vector<1x4xf32>
    %4 = tpu.concatenate %3, %2, %3 in 0 : vector<1x4xf32>, vector<16x4xf32>, vector<1x4xf32> -> vector<18x4xf32>
    %5 = vector.extract_strided_slice %4 {offsets = [0, 0], sizes = [16, 4], strides = [1, 1]} : vector<18x4xf32> to vector<16x4xf32>
    %6 = vector.extract_strided_slice %4 {offsets = [1, 0], sizes = [16, 4], strides = [1, 1]} : vector<18x4xf32> to vector<16x4xf32>
    %7 = vector.extract_strided_slice %4 {offsets = [2, 0], sizes = [16, 4], strides = [1, 1]} : vector<18x4xf32> to vector<16x4xf32>
    %8 = tpu.concatenate %5, %6, %7 in 1 : vector<16x4xf32>, vector<16x4xf32>, vector<16x4xf32> -> vector<16x12xf32>
    %c0_2 = arith.constant 0 : index
    %c0_3 = arith.constant 0 : index
    %9 = vector.load %arg2[%c0_2, %c0_3] : memref<12x4xf32, #tpu.memory_space<vmem>>, vector<12x4xf32>
    %cst_4 = arith.constant dense<0.000000e+00> : vector<16x4xf32>
    %10 = tpu.matmul %8, %9, %cst_4 {dimension_numbers = #tpu.dot_dimension_numbers<[1], [0], [0], [1], [0, 0, 1, 1], [], []>, precision = #tpu.contract_precision<fp32>} : vector<16x12xf32>, vector<12x4xf32>, vector<16x4xf32> -> vector<16x4xf32>
    %c0_5 = arith.constant 0 : index
    %c0_6 = arith.constant 0 : index
    %11 = vector.load %arg3[%c0_5, %c0_6] : memref<1x4xf32, #tpu.memory_space<vmem>>, vector<1x4xf32>
    %12 = vector.broadcast %11 : vector<1x4xf32> to vector<16x4xf32>
    %13 = arith.addf %10, %12 : vector<16x4xf32>
    %c0_7 = arith.constant 0 : index
    %c0_8 = arith.constant 0 : index
    %c0_9 = arith.constant 0 : index
    %14 = vector.load %arg4[%c0_7, %c0_8, %c0_9] : memref<1x16x4xf32, #tpu.memory_space<vmem>>, vector<1x16x4xf32>
    %15 = vector.shape_cast %14 : vector<1x16x4xf32> to vector<16x4xf32>
    %16 = vector.shape_cast %13 : vector<16x4xf32> to vector<1x16x4xf32>
    tpu.vector_store %arg4[%c0_7, %c0_8, %c0_9], %16 {strides = array<i32>} : memref<1x16x4xf32, #tpu.memory_space<vmem>>, vector<1x16x4xf32>,
    %cst_10 = arith.constant dense<0.000000e+00> : vector<4xf32>
    %17 = vector.multi_reduction <add>, %13, %cst_10 [0] : vector<16x4xf32> to vector<4xf32>
    %18 = vector.shape_cast %17 : vector<4xf32> to vector<1x4xf32>
    %19 = arith.mulf %13, %13 : vector<16x4xf32>
    %cst_11 = arith.constant dense<0.000000e+00> : vector<4xf32>
    %20 = vector.multi_reduction <add>, %19, %cst_11 [0] : vector<16x4xf32> to vector<4xf32>
    %21 = vector.shape_cast %20 : vector<4xf32> to vector<1x4xf32>
    %22 = tpu.concatenate %18, %21 in 0 : vector<1x4xf32>, vector<1x4xf32> -> vector<2x4xf32>
    %c0_12 = arith.constant 0 : index
    %c0_13 = arith.constant 0 : index
    %c0_14 = arith.constant 0 : index
    %23 = vector.load %arg5[%c0_12, %c0_13, %c0_14] : memref<1x2x4xf32, #tpu.memory_space<vmem>>, vector<1x2x4xf32>
    %24 = vector.shape_cast %23 : vector<1x2x4xf32> to vector<2x4xf32>
    %25 = vector.shape_cast %22 : vector<2x4xf32> to vector<1x2x4xf32>
    tpu.vector_store %arg5[%c0_12, %c0_13, %c0_14], %25 {strides = array<i32>} : memref<1x2x4xf32, #tpu.memory_space<vmem>>, vector<1x2x4xf32>,
    return
  }
  func.func @transform_0(%arg0: i32) -> (i32, i32, i32) {
    %c0_i32 = arith.constant 0 : i32
    %c0_i32_0 = arith.constant 0 : i32
    %c0_i32_1 = arith.constant 0 : i32
    return %arg0, %c0_i32, %c0_i32_0 : i32, i32, i32
  }
  func.func @transform_1(%arg0: i32) -> (i32, i32) {
    %c0_i32 = arith.constant 0 : i32
    %c0_i32_0 = arith.constant 0 : i32
    %c0_i32_1 = arith.constant 0 : i32
    return %c0_i32, %c0_i32_0 : i32, i32
  }
  func.func @transform_2(%arg0: i32) -> (i32, i32) {
    %c0_i32 = arith.constant 0 : i32
    %c0_i32_0 = arith.constant 0 : i32
    %c0_i32_1 = arith.constant 0 : i32
    return %c0_i32, %c0_i32_0 : i32, i32
  }
  func.func @transform_3(%arg0: i32) -> (i32, i32, i32) {
    %c0_i32 = arith.constant 0 : i32
    %c0_i32_0 = arith.constant 0 : i32
    %c0_i32_1 = arith.constant 0 : i32
    return %arg0, %c0_i32, %c0_i32_0 : i32, i32, i32
  }
  func.func @transform_4(%arg0: i32) -> (i32, i32, i32) {
    %c0_i32 = arith.constant 0 : i32
    %c0_i32_0 = arith.constant 0 : i32
    %c0_i32_1 = arith.constant 0 : i32
    return %arg0, %c0_i32, %c0_i32_0 : i32, i32, i32
  }
}

module attributes {stable_mosaic.version = 11 : i64} {
  func.func @_stage2_kernel(%arg0: i32, %arg1: memref<1x16x4xf32, #tpu.memory_space<vmem>>, %arg2: memref<1x4xf32, #tpu.memory_space<vmem>>, %arg3: memref<1x4xf32, #tpu.memory_space<vmem>>, %arg4: memref<12x8xf32, #tpu.memory_space<vmem>>, %arg5: memref<1x8xf32, #tpu.memory_space<vmem>>, %arg6: memref<1x8x8xf32, #tpu.memory_space<vmem>>, %arg7: memref<1x2x8xf32, #tpu.memory_space<vmem>>, %arg8: memref<18x4xf32, #tpu.memory_space<vmem>>) attributes {dimension_semantics = [#tpu.dimension_semantics<parallel>], iteration_bounds = array<i64: 2>, scalar_prefetch = 0 : i64, scratch_operands = 1 : i64, tpu.core_type = #tpu.core_type<tc>, window_params = [{transform_indices = @transform_0, window_bounds = array<i64: 1, 16, 4>}, {pipeline_mode = #tpu.pipeline_mode<synchronous>, transform_indices = @transform_1, window_bounds = array<i64: 1, 4>}, {pipeline_mode = #tpu.pipeline_mode<synchronous>, transform_indices = @transform_2, window_bounds = array<i64: 1, 4>}, {pipeline_mode = #tpu.pipeline_mode<synchronous>, transform_indices = @transform_3, window_bounds = array<i64: 12, 8>}, {pipeline_mode = #tpu.pipeline_mode<synchronous>, transform_indices = @transform_4, window_bounds = array<i64: 1, 8>}, {transform_indices = @transform_5, window_bounds = array<i64: 1, 8, 8>}, {transform_indices = @transform_6, window_bounds = array<i64: 1, 2, 8>}]} {
    %c0 = arith.constant 0 : index
    %c0_0 = arith.constant 0 : index
    %c0_1 = arith.constant 0 : index
    %0 = vector.load %arg1[%c0, %c0_0, %c0_1] : memref<1x16x4xf32, #tpu.memory_space<vmem>>, vector<1x16x4xf32>
    %1 = vector.shape_cast %0 : vector<1x16x4xf32> to vector<16x4xf32>
    %c0_2 = arith.constant 0 : index
    %c0_3 = arith.constant 0 : index
    %2 = vector.load %arg2[%c0_2, %c0_3] : memref<1x4xf32, #tpu.memory_space<vmem>>, vector<1x4xf32>
    %3 = vector.broadcast %2 : vector<1x4xf32> to vector<16x4xf32>
    %4 = arith.mulf %1, %3 : vector<16x4xf32>
    %c0_4 = arith.constant 0 : index
    %c0_5 = arith.constant 0 : index
    %5 = vector.load %arg3[%c0_4, %c0_5] : memref<1x4xf32, #tpu.memory_space<vmem>>, vector<1x4xf32>
    %6 = vector.broadcast %5 : vector<1x4xf32> to vector<16x4xf32>
    %7 = arith.addf %4, %6 : vector<16x4xf32>
    %8 = arith.negf %7 : vector<16x4xf32>
    %9 = math.exp %8 : vector<16x4xf32>
    %cst = arith.constant 1.000000e+00 : f32
    %10 = vector.broadcast %cst : f32 to vector<16x4xf32>
    %11 = arith.addf %10, %9 : vector<16x4xf32>
    %12 = arith.divf %10, %11 : vector<16x4xf32>
    %13 = arith.mulf %7, %12 : vector<16x4xf32>
    %cst_6 = arith.constant 0.000000e+00 : f32
    %14 = vector.broadcast %cst_6 : f32 to vector<18x4xf32>
    %c0_7 = arith.constant 0 : index
    %c0_8 = arith.constant 0 : index
    %15 = vector.load %arg8[%c0_7, %c0_8] : memref<18x4xf32, #tpu.memory_space<vmem>>, vector<18x4xf32>
    tpu.vector_store %arg8[%c0_7, %c0_8], %14 {strides = array<i32>} : memref<18x4xf32, #tpu.memory_space<vmem>>, vector<18x4xf32>,
    %c1 = arith.constant 1 : index
    %c0_9 = arith.constant 0 : index
    %16 = vector.load %arg8[%c1, %c0_9] : memref<18x4xf32, #tpu.memory_space<vmem>>, vector<16x4xf32>
    tpu.vector_store %arg8[%c1, %c0_9], %13 {strides = array<i32>} : memref<18x4xf32, #tpu.memory_space<vmem>>, vector<16x4xf32>,
    %c0_10 = arith.constant 0 : index
    %c0_11 = arith.constant 0 : index
    %17 = tpu.strided_load %arg8[%c0_10, %c0_11] {strides = array<i32: 2, 1>} : memref<18x4xf32, #tpu.memory_space<vmem>>, vector<8x4xf32>
    %c1_12 = arith.constant 1 : index
    %c0_13 = arith.constant 0 : index
    %18 = tpu.strided_load %arg8[%c1_12, %c0_13] {strides = array<i32: 2, 1>} : memref<18x4xf32, #tpu.memory_space<vmem>>, vector<8x4xf32>
    %c2 = arith.constant 2 : index
    %c0_14 = arith.constant 0 : index
    %19 = tpu.strided_load %arg8[%c2, %c0_14] {strides = array<i32: 2, 1>} : memref<18x4xf32, #tpu.memory_space<vmem>>, vector<8x4xf32>
    %20 = tpu.concatenate %17, %18, %19 in 1 : vector<8x4xf32>, vector<8x4xf32>, vector<8x4xf32> -> vector<8x12xf32>
    %c0_15 = arith.constant 0 : index
    %c0_16 = arith.constant 0 : index
    %21 = vector.load %arg4[%c0_15, %c0_16] : memref<12x8xf32, #tpu.memory_space<vmem>>, vector<12x8xf32>
    %cst_17 = arith.constant dense<0.000000e+00> : vector<8x8xf32>
    %22 = tpu.matmul %20, %21, %cst_17 {dimension_numbers = #tpu.dot_dimension_numbers<[1], [0], [0], [1], [0, 0, 1, 1], [], []>, precision = #tpu.contract_precision<fp32>} : vector<8x12xf32>, vector<12x8xf32>, vector<8x8xf32> -> vector<8x8xf32>
    %c0_18 = arith.constant 0 : index
    %c0_19 = arith.constant 0 : index
    %23 = vector.load %arg5[%c0_18, %c0_19] : memref<1x8xf32, #tpu.memory_space<vmem>>, vector<1x8xf32>
    %24 = vector.broadcast %23 : vector<1x8xf32> to vector<8x8xf32>
    %25 = arith.addf %22, %24 : vector<8x8xf32>
    %c0_20 = arith.constant 0 : index
    %c0_21 = arith.constant 0 : index
    %c0_22 = arith.constant 0 : index
    %26 = vector.load %arg6[%c0_20, %c0_21, %c0_22] : memref<1x8x8xf32, #tpu.memory_space<vmem>>, vector<1x8x8xf32>
    %27 = vector.shape_cast %26 : vector<1x8x8xf32> to vector<8x8xf32>
    %28 = vector.shape_cast %25 : vector<8x8xf32> to vector<1x8x8xf32>
    tpu.vector_store %arg6[%c0_20, %c0_21, %c0_22], %28 {strides = array<i32>} : memref<1x8x8xf32, #tpu.memory_space<vmem>>, vector<1x8x8xf32>,
    %cst_23 = arith.constant dense<0.000000e+00> : vector<8xf32>
    %29 = vector.multi_reduction <add>, %25, %cst_23 [0] : vector<8x8xf32> to vector<8xf32>
    %30 = vector.shape_cast %29 : vector<8xf32> to vector<1x8xf32>
    %31 = arith.mulf %25, %25 : vector<8x8xf32>
    %cst_24 = arith.constant dense<0.000000e+00> : vector<8xf32>
    %32 = vector.multi_reduction <add>, %31, %cst_24 [0] : vector<8x8xf32> to vector<8xf32>
    %33 = vector.shape_cast %32 : vector<8xf32> to vector<1x8xf32>
    %34 = tpu.concatenate %30, %33 in 0 : vector<1x8xf32>, vector<1x8xf32> -> vector<2x8xf32>
    %c0_25 = arith.constant 0 : index
    %c0_26 = arith.constant 0 : index
    %c0_27 = arith.constant 0 : index
    %35 = vector.load %arg7[%c0_25, %c0_26, %c0_27] : memref<1x2x8xf32, #tpu.memory_space<vmem>>, vector<1x2x8xf32>
    %36 = vector.shape_cast %35 : vector<1x2x8xf32> to vector<2x8xf32>
    %37 = vector.shape_cast %34 : vector<2x8xf32> to vector<1x2x8xf32>
    tpu.vector_store %arg7[%c0_25, %c0_26, %c0_27], %37 {strides = array<i32>} : memref<1x2x8xf32, #tpu.memory_space<vmem>>, vector<1x2x8xf32>,
    return
  }
  func.func @transform_0(%arg0: i32) -> (i32, i32, i32) {
    %c0_i32 = arith.constant 0 : i32
    %c0_i32_0 = arith.constant 0 : i32
    %c0_i32_1 = arith.constant 0 : i32
    return %arg0, %c0_i32, %c0_i32_0 : i32, i32, i32
  }
  func.func @transform_1(%arg0: i32) -> (i32, i32) {
    %c0_i32 = arith.constant 0 : i32
    %c0_i32_0 = arith.constant 0 : i32
    %c0_i32_1 = arith.constant 0 : i32
    return %c0_i32, %c0_i32_0 : i32, i32
  }
  func.func @transform_2(%arg0: i32) -> (i32, i32) {
    %c0_i32 = arith.constant 0 : i32
    %c0_i32_0 = arith.constant 0 : i32
    %c0_i32_1 = arith.constant 0 : i32
    return %c0_i32, %c0_i32_0 : i32, i32
  }
  func.func @transform_3(%arg0: i32) -> (i32, i32) {
    %c0_i32 = arith.constant 0 : i32
    %c0_i32_0 = arith.constant 0 : i32
    %c0_i32_1 = arith.constant 0 : i32
    return %c0_i32, %c0_i32_0 : i32, i32
  }
  func.func @transform_4(%arg0: i32) -> (i32, i32) {
    %c0_i32 = arith.constant 0 : i32
    %c0_i32_0 = arith.constant 0 : i32
    %c0_i32_1 = arith.constant 0 : i32
    return %c0_i32, %c0_i32_0 : i32, i32
  }
  func.func @transform_5(%arg0: i32) -> (i32, i32, i32) {
    %c0_i32 = arith.constant 0 : i32
    %c0_i32_0 = arith.constant 0 : i32
    %c0_i32_1 = arith.constant 0 : i32
    return %arg0, %c0_i32, %c0_i32_0 : i32, i32, i32
  }
  func.func @transform_6(%arg0: i32) -> (i32, i32, i32) {
    %c0_i32 = arith.constant 0 : i32
    %c0_i32_0 = arith.constant 0 : i32
    %c0_i32_1 = arith.constant 0 : i32
    return %arg0, %c0_i32, %c0_i32_0 : i32, i32, i32
  }
}

module attributes {stable_mosaic.version = 11 : i64} {
  func.func @_stage3_kernel(%arg0: i32, %arg1: memref<1x8x8xf32, #tpu.memory_space<vmem>>, %arg2: memref<1x8xf32, #tpu.memory_space<vmem>>, %arg3: memref<1x8xf32, #tpu.memory_space<vmem>>, %arg4: memref<1x8x8xf32, #tpu.memory_space<vmem>>) attributes {dimension_semantics = [#tpu.dimension_semantics<parallel>], iteration_bounds = array<i64: 2>, scalar_prefetch = 0 : i64, scratch_operands = 0 : i64, tpu.core_type = #tpu.core_type<tc>, window_params = [{transform_indices = @transform_0, window_bounds = array<i64: 1, 8, 8>}, {pipeline_mode = #tpu.pipeline_mode<synchronous>, transform_indices = @transform_1, window_bounds = array<i64: 1, 8>}, {pipeline_mode = #tpu.pipeline_mode<synchronous>, transform_indices = @transform_2, window_bounds = array<i64: 1, 8>}, {transform_indices = @transform_3, window_bounds = array<i64: 1, 8, 8>}]} {
    %c0 = arith.constant 0 : index
    %c0_0 = arith.constant 0 : index
    %c0_1 = arith.constant 0 : index
    %0 = vector.load %arg1[%c0, %c0_0, %c0_1] : memref<1x8x8xf32, #tpu.memory_space<vmem>>, vector<1x8x8xf32>
    %1 = vector.shape_cast %0 : vector<1x8x8xf32> to vector<8x8xf32>
    %c0_2 = arith.constant 0 : index
    %c0_3 = arith.constant 0 : index
    %2 = vector.load %arg2[%c0_2, %c0_3] : memref<1x8xf32, #tpu.memory_space<vmem>>, vector<1x8xf32>
    %3 = vector.broadcast %2 : vector<1x8xf32> to vector<8x8xf32>
    %4 = arith.mulf %1, %3 : vector<8x8xf32>
    %c0_4 = arith.constant 0 : index
    %c0_5 = arith.constant 0 : index
    %5 = vector.load %arg3[%c0_4, %c0_5] : memref<1x8xf32, #tpu.memory_space<vmem>>, vector<1x8xf32>
    %6 = vector.broadcast %5 : vector<1x8xf32> to vector<8x8xf32>
    %7 = arith.addf %4, %6 : vector<8x8xf32>
    %8 = arith.negf %7 : vector<8x8xf32>
    %9 = math.exp %8 : vector<8x8xf32>
    %cst = arith.constant 1.000000e+00 : f32
    %10 = vector.broadcast %cst : f32 to vector<8x8xf32>
    %11 = arith.addf %10, %9 : vector<8x8xf32>
    %12 = arith.divf %10, %11 : vector<8x8xf32>
    %13 = arith.mulf %7, %12 : vector<8x8xf32>
    %14 = tpu.transpose %13, [1, 0] : vector<8x8xf32> -> vector<8x8xf32>
    %c0_6 = arith.constant 0 : index
    %c0_7 = arith.constant 0 : index
    %c0_8 = arith.constant 0 : index
    %15 = vector.load %arg4[%c0_6, %c0_7, %c0_8] : memref<1x8x8xf32, #tpu.memory_space<vmem>>, vector<1x8x8xf32>
    %16 = vector.shape_cast %15 : vector<1x8x8xf32> to vector<8x8xf32>
    %17 = vector.shape_cast %14 : vector<8x8xf32> to vector<1x8x8xf32>
    tpu.vector_store %arg4[%c0_6, %c0_7, %c0_8], %17 {strides = array<i32>} : memref<1x8x8xf32, #tpu.memory_space<vmem>>, vector<1x8x8xf32>,
    return
  }
  func.func @transform_0(%arg0: i32) -> (i32, i32, i32) {
    %c0_i32 = arith.constant 0 : i32
    %c0_i32_0 = arith.constant 0 : i32
    %c0_i32_1 = arith.constant 0 : i32
    return %arg0, %c0_i32, %c0_i32_0 : i32, i32, i32
  }
  func.func @transform_1(%arg0: i32) -> (i32, i32) {
    %c0_i32 = arith.constant 0 : i32
    %c0_i32_0 = arith.constant 0 : i32
    %c0_i32_1 = arith.constant 0 : i32
    return %c0_i32, %c0_i32_0 : i32, i32
  }
  func.func @transform_2(%arg0: i32) -> (i32, i32) {
    %c0_i32 = arith.constant 0 : i32
    %c0_i32_0 = arith.constant 0 : i32
    %c0_i32_1 = arith.constant 0 : i32
    return %c0_i32, %c0_i32_0 : i32, i32
  }
  func.func @transform_3(%arg0: i32) -> (i32, i32, i32) {
    %c0_i32 = arith.constant 0 : i32
    %c0_i32_0 = arith.constant 0 : i32
    %c0_i32_1 = arith.constant 0 : i32
    return %arg0, %c0_i32, %c0_i32_0 : i32, i32, i32
  }
}

</mosaic_0001>

<bundles_post_ra>
// kernel: convblock_forward.5
= control target key start
LH: loop header
LB: loop body
LE: loop exit
PB: predicated region body
PF: predicated region fallthrough
CT: control target
= control target key end

     0   :  { %8 = vsyncpa [#allocation3], 0  ;;  %s545_s0 = inlined_call_operand.vmem [shape: f32[2,8,8], index: 0, kind: input, shape index: {}]   ;;  %s546_s1 = inlined_call_operand.vmem [shape: f32[1,8], index: 1, kind: input, shape index: {}]   ;;  %s547_s2 = inlined_call_operand.vmem [shape: f32[1,8], index: 2, kind: input, shape index: {}]   ;;  %s548_s3 = inlined_call_operand.hbm [shape: f32[2,8,8], index: 3, kind: output, shape index: {}]  }
   0x1   :  { %10 = vsyncpa [#allocation3 + $0x1], 0  ;;  %s439_s12 = smov 0   ;;  %s441_s13 = smov 0  }
   0x2   :  { %s443_s14 = smov 0   ;;  %s445_s15 = smov 0  }
   0x3 LB: > { %s460_s16 = sadd.s32 4294967295, %s416_s15   ;;  %s297_s17 = sadd.s32 4294967294, %s416_s15   ;;  %s416_s15 = sphi %s445_s15, %s554_s15   ;;  %s412_s14 = sphi %s443_s14, %s553_s14   ;;  %s408_s13 = sphi %s441_s13, %s552_s13   ;;  %s404_s12 = sphi %s439_s12, %s551_s12  }
   0x4   : > { %s464_s18 = sadd.s32 1, %s416_s15   ;;  %s91_s19 = sadd.s32 1, %s412_s14 }
   0x5   : > { %s88_s20 = ssub.s32 %s416_s15, %s464_s18  ;;  %p101_p0 = scmp.ne.s32.totalorder %s412_s14, %s408_s13 }
   0x6   : > { %p89_p1 = scmp.eq.s32.totalorder %s88_s20, 0  ;;  %p102_p2 = scmp.eq.s32.totalorder %s460_s16, 1 }
   0x7   : > { %p107_p3 = scmp.ne.s32.totalorder %s408_s13, %s404_s12  ;;  %p108_p4 = scmp.eq.s32.totalorder %s297_s17, 1 }
   0x8   : > { %s475_s21 = scalar_select %p89_p1, %s412_s14, %s91_s19  }
   0x9   : > { %p477_p5 = por %p102_p2, %p101_p0  ;;  %p481_p6 = por %p108_p4, %p107_p3 }
   0xa   : > { %p300_p7 = scmp.ge.s32.totalorder %s416_s15, 1  ;;  %p139_p8 = scmp.lt.s32.totalorder %s416_s15, 3 }
   0xc   : > { %p140_p9 = pnand %p300_p7, %p139_p8 }
   0xd   : > { %p162_p10 = scmp.lt.s32.totalorder (!%p140_p9), %s460_s16, 1  ;;  %v303_v0 = vld [vmem:[%s546_s1] ss:$0 sm:$0xff] (!%p140_p9)  ;;  %s159_s6 = sand.u32 (!%p140_p9), 1, %s408_s13   ;;  %vm222_vm0 = vcmask (!%p140_p9), 64512  }
   0xe   : > { %143 = sbr.rel (%p140_p9) target bundleno = 201 (0xc9), region = 32  ;;  %v304_v2 = vld [vmem:[%s547_s2] ss:$0 sm:$0xff] (!%p140_p9)  ;;  %s301_s7 = sshll.u32 (!%p140_p9), %s159_s6, 3 }
   0xf   : > { %s307_s8 = sshll.u32 (!%p140_p9), %s460_s16, 7  ;;  %s161_s9 = scalar_lea.vmem (!%p140_p9), [#allocation2], %s301_s7 }
  0x10   : > { %s238_s10 = sshll.u32 (!%p140_p9), %s161_s9, 4  ;;  %s503_s19 = scalar_lea.hbm (!%p140_p9), %s548_s3, %s307_s8  ;;  %s505_s10 = int_to_ptr.vmem [resolvable:$true] %s238_s10 }
  0x11   : > { %s225_s20 = scalar_lea.sflag (!%p140_p9), [#allocation3], %s159_s6 }
  0x15   : > { %s163_s24 = scalar_select %p162_p10, %s460_s16, 1 }
  0x16   : > { %s418_s16 = smov [#allocation2]  }
  0x17   : > { %s302_s25 = sshll.u32 %s163_s24, 3  ;;  %s354_s24 = scalar_lea.vmem %s505_s10, 128 }
  0x18   : > { %s165_s30 = scalar_lea.vmem %s545_s0, %s302_s25  ;;  %p355_p11 = scmp.ne.s32.totalorder %s505_s10, %s354_s24 }
  0x19   : > { %v166_v1 = vld [vmem:[%s165_s30] sm:$0xff]  ;;  %s358_s25 = sshll.u32 %s418_s16, 4  ;;  %s359_s25 = int_to_ptr.vmem [resolvable:$false] %s358_s25 }
  0x1a   : > { %v174_v3 = vmul.f32 %v303_v0, %v166_v1  ;;  %p356_p12 = pnand %p355_p11, %p477_p5  ;;  %s360_s26 = scalar_lea.vmem %s359_s25, 256 }
  0x1b   : > { %p361_p0 = scmp.lt.s32.totalorder %s505_s10, %s359_s25  ;;  %p362_p1 = scmp.lt.s32.totalorder %s360_s26, %s354_s24 }
  0x1c   : > { %v182_v4 = vadd.f32 %v304_v2, %v174_v3  ;;  %p357_p13 = pneg %p356_p12 }
  0x1d   : > { %p363_p2 = por %p362_p1, %p361_p0 }
  0x1e   : > { %v305_v5 = vmul.f32 -1.442695, %v182_v4 }
  0x1f   : > { %p364_p3 = pnand %p363_p2, %p357_p13 }
  0x20   : > { %350 = vpow2.f32 %v305_v5 }
  0x2a   : > { %v351_v6 = vpop.eup %350 }
  0x2b   : > { %v186_v7 = vadd.f32 1.0, %v351_v6 }
  0x2d   : > { %352 = vrcp.f32 %v186_v7 }
  0x37   : > { %v353_v8 = vpop.eup %352 }
  0x38   : > { %v189_v9 = vmul.f32 %v353_v8, %v182_v4 }
  0x3a   : > { %190 = vxpose.xlu0.b32.start.end [1/1] (short) (narrow) %v189_v9, 8 }
  0xba   : > { %v206_v10 = vpop.trf.xlu0 }
  0xbb   : > { %223 = vst.msk [vmem:[%s161_s9] sm:$0xff] %vm222_vm0, %v206_v10 }
  0xbc   : > { %367 = shalt.err (!%p364_p3)
}
  0xbd   : > { %s368_s27 = scalar_lea.hbm %s503_s19, 128  ;;  %s372_s30 = scalar_lea.hbm %s548_s3, 256 }
  0xbe   : > { %p369_p4 = scmp.ne.s32.totalorder %s503_s19, %s368_s27  ;;  %p373_p9 = scmp.lt.u32.totalorder %s503_s19, %s548_s3 }
  0xbf   : > { %p374_p10 = scmp.lt.u32.totalorder %s372_s30, %s368_s27  ;;  %p376_p12 = scmp.lt.u32.totalorder %s368_s27, %s503_s19 }
  0xc0   : > { %p370_p7 = pnand %p369_p4, %p477_p5 }
  0xc1   : > { %p375_p11 = por %p374_p10, %p373_p9 }
  0xc2   : > { %p371_p8 = pneg %p370_p7 }
  0xc3   : > { %p377_p13 = por %p376_p12, %p375_p11 }
  0xc5   : > { %p378_p0 = pnand %p377_p13, %p371_p8 }
  0xc7   : > { %381 = shalt.err (!%p378_p0)
}
  0xc8   : > { %310 = dma.vmem_to_hbm [thread:$0]  (%p477_p5), %s505_s10, 128, %s503_s19, %s225_s20  }
  0xc9 PF: > { %p316_p1 = scmp.ge.s32.totalorder %s416_s15, 2  ;;  %s250_s6 = sand.u32 1, %s404_s12  }
  0xca   : > { %s251_s7 = scalar_lea.sflag [#allocation3], %s250_s6 }
  0xcb   : > { %p313_p2 = pnand %p316_p1, %p481_p6 }
  0xcd   : > { %399 = dma.done.wait (!%p313_p2), %s251_s7, 128  }
  0xce   : > { %401 = vsyncadd (!%p313_p2), %s251_s7, 4294967168  ;;  %p13_p3 = scmp.ge.s32.totalorder %s464_s18, 4   ;;  %s551_s12 = smov %s408_s13 }
  0xcf   : > { %s552_s13 = smov %s412_s14  ;;  %s553_s14 = smov %s475_s21 }
  0xd0   : > { %s554_s15 = smov %s464_s18  ;;  %15 = sbr.rel (!%p13_p3) target bundleno = 3 (0x3), region = 67 }
  0xd7   :  { %256 = vsyncpa [#allocation3], 1 }
  0xd8   :  { %258 = vsyncpa [#allocation3 + $0x1], 1 }

// kernel: convblock_forward.3
= control target key start
LH: loop header
LB: loop body
LE: loop exit
PB: predicated region body
PF: predicated region fallthrough
CT: control target
= control target key end

     0   :  { %s1076_s15 = smov 0   ;;  %s1132_s0 = inlined_call_operand.vmem [shape: f32[2,4,16], index: 0, kind: input, shape index: {}]   ;;  %s1133_s1 = inlined_call_operand.vmem [shape: f32[12,4], index: 1, kind: input, shape index: {}]   ;;  %s1134_s2 = inlined_call_operand.vmem [shape: f32[1,4], index: 2, kind: input, shape index: {}]   ;;  %s1135_s3 = inlined_call_operand.vmem [shape: f32[2,16,4], index: 3, kind: output, shape index: {0}]   ;;  %s1136_s4 = inlined_call_operand.vmem [shape: f32[2,2,4], index: 4, kind: output, shape index: {1}]  }
   0x1 LB: > { %s915_s16 = sadd.s32 4294967295, %s1047_s15   ;;  %p919_p0 = scmp.ge.s32.totalorder %s1047_s15, 1  ;;  %s1047_s15 = sphi %s1076_s15, %s15_s15  }
   0x2   : > { %p164_p1 = scmp.lt.s32.totalorder %s1047_s15, 3 }
   0x4   : > { %p165_p2 = pnand %p919_p0, %p164_p1 }
   0x5   : > { %p193_p3 = scmp.lt.s32.totalorder (!%p165_p2), %s915_s16, 1  ;;  %vm241_vm0 = vcmask (!%p165_p2), 1040384   ;;  %v283_v4 = vld [vmem:[%s1133_s1 + $0x8] sm:$0xf] (!%p165_p2)  ;;  %vm298_vm1 = vcmask (!%p165_p2), 1043456   ;;  %v282_v7 = vld [vmem:[%s1133_s1] sm:$0xff] (!%p165_p2) }
   0x6   : > { %168 = sbr.rel (%p165_p2) target bundleno = 543 (0x21f), region = 32  ;;  %v300_v8 = vsel (!%p165_p2), %vm298_vm1, %v283_v4, 0  ;;  %v303_v9 = vand.u32 (!%p165_p2), 4294901760, %v282_v7  ;;  %vm252_vm2 = vcmask (!%p165_p2), 1046528   ;;  %s1049_s25 = smov (!%p165_p2), 4   ;;  %vm264_vm3 = vcmask (!%p165_p2), 1045504  }
   0x7   : > { %v306_v10 = vand.u32 (!%p165_p2), 4294901760, %v300_v8  ;;  %s1050_s26 = smov (!%p165_p2), 8   ;;  %vm276_vm4 = vcmask (!%p165_p2), 31744   ;;  %vm279_vm5 = vcmask (!%p165_p2), 64512   ;;  %vm291_vm6 = vcmask (!%p165_p2), 97280  }
   0x8   : > { %v391_v21 = vsub.f32 (!%p165_p2), %v282_v7, %v303_v9  ;;  %v924_v57 = vld [vmem:[%s1134_s2] ss:$0 sm:$0xff] (!%p165_p2)  ;;  %vm827_vm7 = vcmask (!%p165_p2), 25600  }
   0x9   : > { %v1099_v16 = vpack.c.bf16 (!%p165_p2), %v306_v10, %v303_v9  ;;  %v398_v22 = vsub.f32 (!%p165_p2), %v300_v8, %v306_v10 }
   0xa   : > { %v392_v25 = vand.u32 (!%p165_p2), 4294901760, %v391_v21 }
   0xb   : > { %1007 = vmatprep.subr.bf16.mxu0 (!%p165_p2), %v1099_v16  ;;  %995 = vmatprep.subr.bf16.mxu1 (!%p165_p2), %v1099_v16  ;;  %v399_v26 = vand.u32 (!%p165_p2), 4294901760, %v398_v22  ;;  %v1002_v34 = vpack.c.bf16 (!%p165_p2), %v398_v22, %v391_v21 }
   0xc   : > { %1009 = vmatpush3.bf16.msra.mxu0 (!%p165_p2), %v1099_v16  ;;  %997 = vmatpush3.bf16.msra.mxu1 (!%p165_p2), %v1099_v16  ;;  %v393_v27 = vsub.f32 (!%p165_p2), %v391_v21, %v392_v25 }
   0xd   : > { %s1138_s16 = smov (!%p193_p3, %s915_s16), 1  ;;  %v400_v28 = vsub.f32 %v398_v22, %v399_v26  ;;  %v1010_v29 = vpack.c.bf16 %v399_v26, %v392_v25 }
   0xe   : > { %s920_s17 = sshll.u32 %s1138_s16, 2  ;;  %v394_v31 = vand.u32 4294901760, %v393_v27  ;;  %s927_s29 = sshll.u32 %s1138_s16, 4 }
   0xf   : > { %s196_s20 = scalar_lea.vmem %s1132_s0, %s920_s17  ;;  %v401_v32 = vand.u32 4294901760, %v400_v28  ;;  %1011 = vmatprep.subr.bf16.mxu0 %v1010_v29  ;;  %s201_s6 = scalar_lea.vmem %s1135_s3, %s927_s29 }
  0x10   : > { %v206_v0 = vld [vmem:[%s196_s20] sm:$0xf]  ;;  %s923_s7 = sshll.u32 %s1138_s16, 1 }
  0x11   : > { %207 = vxpose.xlu0.b32.start.end [1/1] (short) (narrow) %v206_v0, 16  ;;  %v998_v33 = vpack.c.bf16 %v401_v32, %v394_v31  ;;  %s205_s10 = scalar_lea.vmem %s1136_s4, %s923_s7 }
  0x13   : > { %999 = vmatprep.subr.bf16.mxu1 %v998_v33 }
  0x91   : > { %v223_v1 = vpop.trf.xlu0 }
  0x92   : > { %v242_v2 = vrot.slane %v223_v1, 7 }
  0x94   : > { %v248_v5 = vsel %vm241_vm0, 0.0, %v242_v2 }
  0x95   : > { %v224_v3 = vpop.trf.xlu0  ;;  %v253_v13 = vrot.slane %v248_v5, 1  ;;  %v265_v20 = vrot.slane %v248_v5, 2 }
  0x96   : > { %v243_v6 = vrot.slane %v224_v3, 7 }
  0x98   : > { %v244_v11 = vsel %vm241_vm0, %v242_v2, %v243_v6  ;;  %v249_v12 = vsel %vm241_vm0, %v243_v6, 0.0 }
  0x99   : > { %v256_v14 = vrot.slane %v249_v12, 1  ;;  %v254_v15 = vrot.slane %v244_v11, 1  ;;  %v266_v19 = vrot.slane %v244_v11, 2  ;;  %v268_v23 = vrot.slane %v249_v12, 2 }
  0x9b   : > { %v257_v17 = vsel %vm252_vm2, %v254_v15, %v256_v14  ;;  %v255_v18 = vsel %vm252_vm2, %v253_v13, %v254_v15  ;;  %v267_v24 = vsel %vm264_vm3, %v265_v20, %v266_v19  ;;  %v269_v30 = vsel %vm264_vm3, %v266_v19, %v268_v23 }
  0x9c   : > { %260 = vrot.lane.b32.xlu1 %v257_v17, %s1049_s25  ;;  %258 = vrot.lane.b32.xlu0 %v255_v18, %s1049_s25 }
  0xa0   : > { %270 = vrot.lane.b32.xlu1 %v267_v24, %s1050_s26 }
  0xa4   : > { %272 = vrot.lane.b32.xlu1 %v269_v30, %s1050_s26 }
 0x10e   : > { %v261_v35 = vpop.permute.xlu1 %260  ;;  %v259_v36 = vpop.permute.xlu0 %258 }
 0x10f   : > { %v277_v37 = vsel %vm276_vm4, %v248_v5, %v259_v36  ;;  %v278_v42 = vsel %vm276_vm4, %v244_v11, %v261_v35 }
 0x112   : > { %v271_v38 = vpop.permute.xlu1 %270 }
 0x113   : > { %v280_v39 = vsel %vm279_vm5, %v277_v37, %v271_v38 }
 0x114   : > { %v293_v40 = vsel %vm291_vm6, %v280_v39, 0 }
 0x115   : > { %v369_v41 = vand.u32 4294901760, %v293_v40 }
 0x116   : > { %v273_v43 = vpop.permute.xlu1 %272 }
 0x117   : > { %v370_v44 = vsub.f32 %v293_v40, %v369_v41  ;;  %v281_v45 = vsel %vm279_vm5, %v278_v42, %v273_v43 }
 0x118   : > { %v296_v46 = vsel %vm291_vm6, %v281_v45, 0 }
 0x119   : > { %v379_v47 = vand.u32 4294901760, %v296_v46  ;;  %v371_v48 = vand.u32 4294901760, %v370_v44 }
 0x11b   : > { %v380_v49 = vsub.f32 %v296_v46, %v379_v47  ;;  %977 = vmatprep.mubr.f32.mxu0 %v371_v48  ;;  %v372_v50 = vsub.f32 %v370_v44, %v371_v48 }
 0x11d   : > { %v373_v51 = vand.u32 4294901760, %v372_v50  ;;  %v381_v52 = vand.u32 4294901760, %v380_v49 }
 0x11f   : > { %956 = vmatprep.mubr.f32.mxu1 %v373_v51  ;;  %978 = vmatmul.mubr.f32.vlgmr.msra.gmra.mrb[0].mxu0 %v381_v52  ;;  %v382_v53 = vsub.f32 %v380_v49, %v381_v52 }
 0x120   : > { %984 = vmatprep.mubr.f32.mxu0 %v369_v41  ;;  %1013 = vmatpush3.bf16.msra.mxu0 %v1010_v29 }
 0x121   : > { %v383_v54 = vand.u32 4294901760, %v382_v53  ;;  %1015 = vmatprep.subr.bf16.mxu0 %v1099_v16 }
 0x123   : > { %957 = vmatmul.mubr.f32.vlgmr.msra.gmra.mrb[0].mxu1 %v383_v54 }
 0x124   : > { %1001 = vmatpush3.bf16.msra.mxu1 %v998_v33  ;;  %963 = vmatprep.mubr.f32.mxu1 %v369_v41 }
 0x125   : > { %1003 = vmatprep.subr.bf16.mxu1 %v1002_v34 }
 0x127   : > { %985 = vmatmul.mubr.f32.vlgmr.msra.gmra.mrb[0].mxu0 %v379_v47 }
 0x128   : > { %991 = vmatprep.mubr.f32.mxu0 %v369_v41  ;;  %1017 = vmatpush3.bf16.msra.mxu0 %v1099_v16 }
 0x12b   : > { %964 = vmatmul.mubr.f32.vlgmr.msra.gmra.mrb[0].mxu1 %v379_v47 }
 0x12c   : > { %1005 = vmatpush3.bf16.msra.mxu1 %v1002_v34  ;;  %970 = vmatprep.mubr.f32.mxu1 %v370_v44 }
 0x12f   : > { %992 = vmatmul.mubr.f32.vlgmr.msra.gmra.mrb[0].mxu0 %v379_v47 }
 0x133   : > { %971 = vmatmul.mubr.f32.vlgmr.msra.gmra.mrb[0].mxu1 %v380_v49 }
 0x202   : > { %v993_v55 = vpop.f32.mrb[0].mxu0 }
 0x203   : > { %v794_v56 = vpop.f32.mrb[1].mxu0 }
 0x206   : > { %v972_v58 = vpop.f32.mrb[0].mxu1 }
 0x207   : > { %v1018_v59 = vadd.f32 %v972_v58, %v924_v57  ;;  %v548_v60 = vpop.f32.mrb[1].mxu1 }
 0x208   : > { %v1020_v61 = vadd.f32 %v924_v57, %v548_v60 }
 0x209   : > { %v1019_v62 = vadd.f32 %v1018_v59, %v993_v55 }
 0x20a   : > { %v1021_v63 = vadd.f32 %v1020_v61, %v794_v56 }
 0x20b   : > { %805 = vst.msk [vmem:[%s201_s6 + $0x8] sm:$0xff] %vm276_vm4, %v1019_v62  ;;  %v807_v0 = vsel %vm276_vm4, %v1019_v62, 0.0  ;;  %v816_v1 = vmul.f32 %v1019_v62, %v1019_v62 }
 0x20c   : > { %804 = vst.msk [vmem:[%s201_s6] sm:$0xff] %vm276_vm4, %v1021_v63  ;;  %v806_v2 = vsel %vm276_vm4, %v1021_v63, 0.0  ;;  %v815_v3 = vmul.f32 %v1021_v63, %v1021_v63 }
 0x20d   : > { %v818_v4 = vsel %vm276_vm4, %v816_v1, 0.0  ;;  %v808_v5 = vadd.f32 %v807_v0, %v806_v2 }
 0x20e   : > { %v817_v6 = vsel %vm276_vm4, %v815_v3, 0.0 }
 0x20f   : > { %v809_v7 = vrot.slane %v808_v5, 4  ;;  %v819_v8 = vadd.f32 %v818_v4, %v817_v6 }
 0x211   : > { %v810_v9 = vadd.f32 %v809_v7, %v808_v5  ;;  %v820_v10 = vrot.slane %v819_v8, 4 }
 0x213   : > { %v811_v11 = vrot.slane %v810_v9, 2  ;;  %v821_v12 = vadd.f32 %v820_v10, %v819_v8 }
 0x215   : > { %v812_v13 = vadd.f32 %v811_v11, %v810_v9  ;;  %v822_v14 = vrot.slane %v821_v12, 2 }
 0x217   : > { %v813_v15 = vrot.slane %v812_v13, 1  ;;  %v823_v16 = vadd.f32 %v822_v14, %v821_v12 }
 0x219   : > { %v824_v17 = vrot.slane %v823_v16, 1  ;;  %v814_v18 = vadd.f32 %v813_v15, %v812_v13 }
 0x21b   : > { %v825_v19 = vadd.f32 %v824_v17, %v823_v16 }
 0x21d   : > { %v826_v20 = vsel %vm241_vm0, %v814_v18, %v825_v19 }
 0x21e   : > { %828 = vst.msk [vmem:[%s205_s10] sm:$0x3] %vm827_vm7, %v826_v20 }
 0x21f PF: > { %s15_s15 = sadd.s32 1, %s1047_s15  }
 0x220   : > { %p12_p4 = scmp.ge.s32.totalorder %s15_s15, 4  }
 0x222   :  { %14 = sbr.rel (!%p12_p4) target bundleno = 1 (0x1), region = 74 }

// kernel: convblock_forward.4
= control target key start
LH: loop header
LB: loop body
LE: loop exit
PB: predicated region body
PF: predicated region fallthrough
CT: control target
= control target key end

     0   :  { %s1072_s21 = smov 0   ;;  %s1136_s0 = inlined_call_operand.vmem [shape: f32[2,16,4], index: 0, kind: input, shape index: {}]   ;;  %s1137_s1 = inlined_call_operand.vmem [shape: f32[1,4], index: 1, kind: input, shape index: {}]   ;;  %s1138_s2 = inlined_call_operand.vmem [shape: f32[1,4], index: 2, kind: input, shape index: {}]   ;;  %s1139_s3 = inlined_call_operand.vmem [shape: f32[12,8], index: 3, kind: input, shape index: {}]   ;;  %s1140_s4 = inlined_call_operand.vmem [shape: f32[1,8], index: 4, kind: input, shape index: {}]   ;;  %s1141_s5 = inlined_call_operand.vmem [shape: f32[2,8,8], index: 5, kind: output, shape index: {0}]   ;;  %s1142_s6 = inlined_call_operand.vmem [shape: f32[2,2,8], index: 6, kind: output, shape index: {1}]  }
   0x1 LB: > { %s898_s22 = sadd.s32 4294967295, %s1030_s21   ;;  %p902_p0 = scmp.ge.s32.totalorder %s1030_s21, 1  ;;  %s1030_s21 = sphi %s1072_s21, %s17_s21  }
   0x2   : > { %p215_p1 = scmp.lt.s32.totalorder %s1030_s21, 3 }
   0x4   : > { %p216_p2 = pnand %p902_p0, %p215_p1 }
   0x5   : > { %p248_p3 = scmp.lt.s32.totalorder (!%p216_p2), %s898_s22, 1  ;;  %vm295_vm0 = vcmask (!%p216_p2), 31744   ;;  %vm298_vm1 = vcmask (!%p216_p2), 25600   ;;  %v1032_v0 = vmov (!%p216_p2), 0.0   ;;  %v907_v1 = vld [vmem:[%s1137_s1] ss:$0 sm:$0xff] (!%p216_p2) }
   0x6   : > { %219 = sbr.rel (%p216_p2) target bundleno = 438 (0x1b6), region = 40  ;;  %296 = vst.msk [vmem:[#allocation2] sm:$0xff] (!%p216_p2), %vm295_vm0, %v1032_v0  ;;  %297 = vst.msk [vmem:[#allocation2 + $0x8] sm:$0xff] (!%p216_p2), %vm295_vm0, %v1032_v0  ;;  %v908_v4 = vld [vmem:[%s1138_s2] ss:$0 sm:$0xff] (!%p216_p2)  ;;  %vm331_vm2 = vcmask (!%p216_p2), 1043456  }
   0x7   : > { %299 = vst.msk [vmem:[#allocation2 + $0x10] sm:$0x3] (!%p216_p2), %vm298_vm1, %v1032_v0  ;;  %v319_v19 = vld [vmem:[%s1139_s3 + $0x8] sm:$0xf] (!%p216_p2)  ;;  %v318_v20 = vld [vmem:[%s1139_s3] sm:$0xff] (!%p216_p2)  ;;  %v1033_v25 = vmov (!%p216_p2), 0.0|0.0  }
   0x8   : > { %v333_v21 = vsel (!%p216_p2), %vm331_vm2, %v319_v19, 0  ;;  %v336_v22 = vand.u32 (!%p216_p2), 4294901760, %v318_v20  ;;  %984 = vmatprep.subr.bf16.mxu0 (!%p216_p2), %v1033_v25  ;;  %975 = vmatprep.subr.bf16.mxu1 (!%p216_p2), %v1033_v25  ;;  %vm1034_vm3 = vmmov (!%p216_p2), 0   ;;  %s1035_s11 = smov (!%p216_p2), 4   ;;  %s1036_s12 = smov (!%p216_p2), 8   ;;  %vm316_vm4 = vcmask (!%p216_p2), 64512  }
   0x9   : > { %v339_v23 = vand.u32 (!%p216_p2), 4294901760, %v333_v21  ;;  %958 = vmatprep.mubr.msk.f32.mxu0 (!%p216_p2), %vm1034_vm3, %v1032_v0  ;;  %937 = vmatprep.mubr.msk.f32.mxu1 (!%p216_p2), %vm1034_vm3, %v1032_v0  ;;  %vm327_vm5 = vcmask (!%p216_p2), 97280   ;;  %v911_v52 = vld [vmem:[%s1140_s4] ss:$0 sm:$0xff] (!%p216_p2)  ;;  %vm810_vm6 = vcmask (!%p216_p2), 1040384   ;;  %vm812_vm7 = vcmask (!%p216_p2), 58368  }
   0xa   : > { %v414_v26 = vsub.f32 (!%p216_p2), %v318_v20, %v336_v22 }
   0xb   : > { %v976_v24 = vpack.c.bf16 (!%p216_p2), %v339_v23, %v336_v22  ;;  %v421_v27 = vsub.f32 (!%p216_p2), %v333_v21, %v339_v23 }
   0xc   : > { %v415_v29 = vand.u32 (!%p216_p2), 4294901760, %v414_v26 }
   0xd   : > { %s1144_s22 = smov (!%p248_p3, %s898_s22), 1  ;;  %986 = vmatpush3.bf16.msra.mxu0 %v976_v24  ;;  %977 = vmatpush3.bf16.msra.mxu1 %v976_v24  ;;  %v422_v30 = vand.u32 4294901760, %v421_v27  ;;  %v982_v38 = vpack.c.bf16 %v421_v27, %v414_v26 }
   0xe   : > { %s914_s23 = sshll.u32 %s1144_s22, 4  ;;  %978 = vmatprep.subr.bf16.mxu1 %v1033_v25  ;;  %987 = vmatprep.subr.bf16.mxu0 %v1033_v25  ;;  %v416_v32 = vsub.f32 %v414_v26, %v415_v29  ;;  %s905_s15 = sshll.u32 %s1144_s22, 3 }
   0xf   : > { %s252_s28 = scalar_lea.vmem %s1136_s0, %s914_s23  ;;  %v423_v33 = vsub.f32 %v421_v27, %v422_v30  ;;  %v988_v34 = vpack.c.bf16 %v422_v30, %v415_v29  ;;  %s256_s18 = scalar_lea.vmem %s1141_s5, %s905_s15 }
  0x10   : > { %v261_v2 = vld [vmem:[%s252_s28] sm:$0xff]  ;;  %v262_v3 = vld [vmem:[%s252_s28 + $0x8] sm:$0xff]  ;;  %v417_v35 = vand.u32 4294901760, %v416_v32  ;;  %s906_s19 = sshll.u32 %s1144_s22, 1 }
  0x11   : > { %v270_v5 = vmul.f32 %v907_v1, %v261_v2  ;;  %v271_v6 = vmul.f32 %v907_v1, %v262_v3  ;;  %v424_v36 = vand.u32 4294901760, %v423_v33  ;;  %s260_s24 = scalar_lea.vmem %s1142_s6, %s906_s19 }
  0x13   : > { %v279_v7 = vadd.f32 %v908_v4, %v270_v5  ;;  %v280_v8 = vadd.f32 %v908_v4, %v271_v6  ;;  %v979_v37 = vpack.c.bf16 %v424_v36, %v417_v35 }
  0x15   : > { %v909_v9 = vmul.f32 -1.442695, %v279_v7  ;;  %v910_v10 = vmul.f32 -1.442695, %v280_v8 }
  0x17   : > { %1016 = vpow2.f32 %v909_v9 }
  0x18   : > { %1018 = vpow2.f32 %v910_v10 }
  0x21   : > { %v1017_v11 = vpop.eup %1016 }
  0x22   : > { %v1019_v12 = vpop.eup %1018  ;;  %v287_v13 = vadd.f32 1.0, %v1017_v11 }
  0x23   : > { %v288_v14 = vadd.f32 1.0, %v1019_v12 }
  0x24   : > { %1020 = vrcp.f32 %v287_v13 }
  0x25   : > { %1022 = vrcp.f32 %v288_v14 }
  0x2e   : > { %v1021_v15 = vpop.eup %1020 }
  0x2f   : > { %v1023_v16 = vpop.eup %1022  ;;  %v293_v17 = vmul.f32 %v1021_v15, %v279_v7 }
  0x30   : > { %v294_v18 = vmul.f32 %v1023_v16, %v280_v8 }
  0x31   : > { %300 = vst.msk [vmem:[#allocation2 + $0x1] sm:$0xff] %vm295_vm0, %v293_v17 }
  0x32   : > { %301 = vst.msk [vmem:[#allocation2 + $0x9] sm:$0xff] %vm295_vm0, %v294_v18 }
  0x39   : > { %v304_v28 = vld [vmem:[#allocation2 + $0x1] ss:$2 sm:$0xff]  ;;  %v306_v31 = vld [vmem:[#allocation2 + $0x2] ss:$2 sm:$0xff] }
  0x3a   : > { %308 = vrot.lane.b32.xlu0 %v304_v28, %s1035_s11  ;;  %v302_v40 = vld [vmem:[#allocation2] ss:$2 sm:$0xff] }
  0x3e   : > { %312 = vrot.lane.b32.xlu0 %v306_v31, %s1036_s12 }
  0xac   : > { %v309_v39 = vpop.permute.xlu0 %308 }
  0xad   : > { %v315_v41 = vsel %vm295_vm0, %v302_v40, %v309_v39 }
  0xb0   : > { %v313_v42 = vpop.permute.xlu0 %312 }
  0xb1   : > { %v317_v43 = vsel %vm316_vm4, %v315_v41, %v313_v42 }
  0xb2   : > { %v329_v44 = vsel %vm327_vm5, %v317_v43, 0 }
  0xb3   : > { %v402_v45 = vand.u32 4294901760, %v329_v44 }
  0xb5   : > { %v403_v46 = vsub.f32 %v329_v44, %v402_v45 }
  0xb7   : > { %v404_v47 = vand.u32 4294901760, %v403_v46 }
  0xb9   : > { %959 = vmatmul.mubr.f32.vlgmr.msra.gmra.mrb[0].mxu0 %v404_v47  ;;  %v405_v48 = vsub.f32 %v403_v46, %v404_v47 }
  0xba   : > { %989 = vmatpush3.bf16.msra.mxu0 %v988_v34  ;;  %965 = vmatprep.mubr.msk.f32.mxu0 %vm1034_vm3, %v1032_v0 }
  0xbb   : > { %v406_v49 = vand.u32 4294901760, %v405_v48  ;;  %990 = vmatprep.subr.bf16.mxu0 %v1033_v25 }
  0xbd   : > { %938 = vmatmul.mubr.f32.vlgmr.msra.gmra.mrb[0].mxu1 %v406_v49 }
  0xbe   : > { %980 = vmatpush3.bf16.msra.mxu1 %v979_v37  ;;  %944 = vmatprep.mubr.msk.f32.mxu1 %vm1034_vm3, %v1032_v0 }
  0xbf   : > { %981 = vmatprep.subr.bf16.mxu1 %v1033_v25 }
  0xc1   : > { %966 = vmatmul.mubr.f32.vlgmr.msra.gmra.mrb[0].mxu0 %v402_v45 }
  0xc2   : > { %992 = vmatpush3.bf16.msra.mxu0 %v976_v24  ;;  %972 = vmatprep.mubr.msk.f32.mxu0 %vm1034_vm3, %v1032_v0 }
  0xc5   : > { %945 = vmatmul.mubr.f32.vlgmr.msra.gmra.mrb[0].mxu1 %v402_v45 }
  0xc6   : > { %983 = vmatpush3.bf16.msra.mxu1 %v982_v38  ;;  %951 = vmatprep.mubr.msk.f32.mxu1 %vm1034_vm3, %v1032_v0 }
  0xc9   : > { %973 = vmatmul.mubr.f32.vlgmr.msra.gmra.mrb[0].mxu0 %v402_v45 }
  0xcd   : > { %952 = vmatmul.mubr.f32.vlgmr.msra.gmra.mrb[0].mxu1 %v403_v46 }
 0x19c   : > { %v790_v50 = vpop.f32.mrb[0].mxu0 }
 0x19d   : > { %v974_v51 = vpop.f32.mrb[1].mxu0 }
 0x1a0   : > { %v565_v53 = vpop.f32.mrb[0].mxu1 }
 0x1a1   : > { %v993_v54 = vadd.f32 %v911_v52, %v565_v53  ;;  %v953_v55 = vpop.f32.mrb[1].mxu1 }
 0x1a3   : > { %v994_v56 = vadd.f32 %v993_v54, %v790_v50 }
 0x1a5   : > { %794 = vst.msk [vmem:[%s256_s18] sm:$0xff] %vm316_vm4, %v994_v56  ;;  %v795_v57 = vsel %vm316_vm4, %v994_v56, 0.0  ;;  %v802_v58 = vmul.f32 %v994_v56, %v994_v56 }
 0x1a6   : > { %v796_v59 = vrot.slane %v795_v57, 4 }
 0x1a7   : > { %v803_v60 = vsel %vm316_vm4, %v802_v58, 0.0 }
 0x1a8   : > { %v797_v61 = vadd.f32 %v796_v59, %v795_v57  ;;  %v804_v62 = vrot.slane %v803_v60, 4 }
 0x1aa   : > { %v798_v63 = vrot.slane %v797_v61, 2  ;;  %v805_v0 = vadd.f32 %v804_v62, %v803_v60 }
 0x1ac   : > { %v799_v1 = vadd.f32 %v798_v63, %v797_v61  ;;  %v806_v2 = vrot.slane %v805_v0, 2 }
 0x1ae   : > { %v800_v3 = vrot.slane %v799_v1, 1  ;;  %v807_v4 = vadd.f32 %v806_v2, %v805_v0 }
 0x1b0   : > { %v808_v5 = vrot.slane %v807_v4, 1  ;;  %v801_v6 = vadd.f32 %v800_v3, %v799_v1 }
 0x1b2   : > { %v809_v7 = vadd.f32 %v808_v5, %v807_v4 }
 0x1b4   : > { %v811_v8 = vsel %vm810_vm6, %v801_v6, %v809_v7 }
 0x1b5   : > { %813 = vst.msk [vmem:[%s260_s24] sm:$0x3] %vm812_vm7, %v811_v8 }
 0x1b6 PF: > { %s17_s21 = sadd.s32 1, %s1030_s21  }
 0x1b7   : > { %p14_p4 = scmp.ge.s32.totalorder %s17_s21, 4  }
 0x1b9   :  { %16 = sbr.rel (!%p14_p4) target bundleno = 1 (0x1), region = 84 }

</bundles_post_ra>
